<compile_context>
chip_gen: v7x
topology: tpu7x:2x2x1
jax: 0.10.0
libtpu: 0.0.40
codegen_flags: <defaults>
</compile_context>

<pallas_src>
import functools

import jax
import jax.numpy as jnp
from jax.experimental import pallas as pl
from jax.experimental.pallas import tpu as pltpu


def _round_up(n, m):
    return ((n + m - 1) // m) * m


def _cdiv(a, b):
    return -(-a // b)


def ffn_ln_kernel(x_ref, w1_ref, b1_ref, w2_ref, b2_ref, g_ref, beta_ref,
                  o_ref, acc_ref, *, eps):
    k = pl.program_id(1)
    nk = pl.num_programs(1)

    @pl.when(k == 0)
    def _():
        acc_ref[...] = jnp.zeros_like(acc_ref)

    # x tile stays resident across the d_ff axis (its block index ignores k).
    x = x_ref[...]

    # fc1 block + ReLU (MXU matmul, fp32 accumulation).
    h = jnp.dot(x, w1_ref[...], preferred_element_type=jnp.float32)
    h = jnp.maximum(h + b1_ref[...].astype(jnp.float32), 0.0)

    # TODO(synk): dropout_2 / dropout are identity in eval mode; training-mode
    # stochastic masking (pltpu.prng_random_bits) not implemented.

    # fc2 block — cast the activation to the weight dtype (native MXU width),
    # accumulate partial y in fp32 scratch.
    acc_ref[...] += jnp.dot(h.astype(w2_ref.dtype), w2_ref[...],
                            preferred_element_type=jnp.float32)

    @pl.when(k == nk - 1)
    def _():
        # Residual + bias + LayerNorm over the feature (lane) axis, in fp32.
        z = x.astype(jnp.float32) + acc_ref[...] + b2_ref[...].astype(jnp.float32)
        mean = jnp.mean(z, axis=-1, keepdims=True)
        var = jnp.maximum(
            jnp.mean(z * z, axis=-1, keepdims=True) - mean * mean, 0.0)
        zn = (z - mean) * jax.lax.rsqrt(var + eps)
        out = zn * g_ref[...].astype(jnp.float32) + beta_ref[...].astype(jnp.float32)
        o_ref[...] = out.astype(o_ref.dtype)


def position_wise_ffn_ln(x, w1t, b1, w2t, b2, gamma, beta, *,
                         tm=256, tf=512, eps=1e-5, vmem_limit_bytes=48 << 20):
    """Eval-mode forward of PositionWiseFeedForward_LN.

    x:   [B, S, d_model]
    w1t: [d_model, d_ff]   fc1 weight, pre-transposed to [in, out]
    w2t: [d_ff, d_model]   fc2 weight, pre-transposed to [in, out]
    b1:  [d_ff];  b2 / gamma / beta: [d_model]

    Weights are expected pre-transposed once at model-load time.  For best MXU
    throughput (esp. v5e, no bf16 VPU but bf16-native MXU) pass bf16 x/weights;
    accumulation and LayerNorm stay fp32 inside the kernel.  On v6e (128 MiB
    VMEM) tm=512 / vmem_limit_bytes=96<<20 is a reasonable bump; keep
    vmem_limit_bytes <= ~56 MiB on v7x (64 MiB / TC).
    """
    B, S, d_model = x.shape
    d_ff = w1t.shape[1]
    M = B * S

    # ---- Row tiling: split M evenly (avoid padding waste), align to sublane
    # packing, and prefer an even tile count so v7x's 2 TensorCores both work.
    row_align = 16 if x.dtype == jnp.bfloat16 else 8
    n_row_tiles = max(1, _cdiv(M, tm))
    if n_row_tiles % 2 == 1 and M >= 2 * row_align:
        n_row_tiles += 1
    tm_eff = _round_up(_cdiv(M, n_row_tiles), row_align)
    M_pad = _round_up(M, tm_eff)

    x2d = x.reshape(M, d_model)
    if M_pad != M:
        # Ragged tail handled by zero-padding; LayerNorm on padded rows is
        # finite (var=0 -> rsqrt(eps)) and those rows are sliced off below.
        x2d = jnp.pad(x2d, ((0, M_pad - M), (0, 0)))

    # ---- d_ff tiling (reduction axis).  Blocks must be lane-aligned (128) or
    # cover the full axis.  Ideally the zero-padding below is hoisted to model
    # load time; it is cheap and only triggers for awkward d_ff.
    if d_ff <= tf or d_ff < 128:
        tf_eff = d_ff
    else:
        tf_eff = _round_up(min(tf, d_ff), 128)
    d_ff_pad = _round_up(d_ff, tf_eff)
    if d_ff_pad != d_ff:
        pad = d_ff_pad - d_ff
        w1t = jnp.pad(w1t, ((0, 0), (0, pad)))   # zero cols -> relu(0)=0
        b1 = jnp.pad(b1, ((0, pad),))
        w2t = jnp.pad(w2t, ((0, pad), (0, 0)))   # zero rows -> contribute 0
    nk = d_ff_pad // tf_eff

    b1r = b1.reshape(1, d_ff_pad)
    b2r = b2.reshape(1, d_model)
    g_r = gamma.reshape(1, d_model)
    be_r = beta.reshape(1, d_model)

    grid = (M_pad // tm_eff, nk)
    kernel = functools.partial(ffn_ln_kernel, eps=eps)

    w_bytes = (w1t.size + w2t.size) * jnp.dtype(w1t.dtype).itemsize
    io_bytes = 2 * M_pad * d_model * jnp.dtype(x.dtype).itemsize
    cost = pl.CostEstimate(
        flops=4 * M_pad * d_model * d_ff_pad,   # two matmuls
        transcendentals=0,
        bytes_accessed=w_bytes * (M_pad // tm_eff) + io_bytes,
    )

    # TODO(synk): for d_model < 128 (lane-sparse output, as in the toy test)
    # folding rows into the lane axis would avoid masked vst.msk stores;
    # irrelevant for realistic d_model >= 128.
    # TODO(synk): v7x weight-bound decode could split the d_ff axis across the
    # two TensorCores (core_map / VMEM_SHARED weights) to avoid per-core weight
    # duplication; not implemented here.

    out2d = pl.pallas_call(
        kernel,
        out_shape=jax.ShapeDtypeStruct((M_pad, d_model), x.dtype),
        grid_spec=pltpu.PrefetchScalarGridSpec(
            num_scalar_prefetch=0,
            grid=grid,
            in_specs=[
                # x rows: block index ignores k -> loaded once per row tile.
                pl.BlockSpec((tm_eff, d_model), lambda i, k: (i, 0)),
                # Streamed, double-buffered weight/bias blocks along d_ff.
                pl.BlockSpec((d_model, tf_eff), lambda i, k: (0, k)),  # W1^T blk
                pl.BlockSpec((1, tf_eff), lambda i, k: (0, k)),        # b1 blk
                pl.BlockSpec((tf_eff, d_model), lambda i, k: (k, 0)),  # W2^T blk
                # Grid-invariant small vectors.
                pl.BlockSpec((1, d_model), lambda i, k: (0, 0)),       # b2
                pl.BlockSpec((1, d_model), lambda i, k: (0, 0)),       # gamma
                pl.BlockSpec((1, d_model), lambda i, k: (0, 0)),       # beta
            ],
            out_specs=pl.BlockSpec((tm_eff, d_model), lambda i, k: (i, 0)),
            scratch_shapes=[pltpu.VMEM((tm_eff, d_model), jnp.float32)],
        ),
        compiler_params=pltpu.CompilerParams(
            dimension_semantics=("parallel", "arbitrary"),
            vmem_limit_bytes=vmem_limit_bytes,
        ),
        cost_estimate=cost,
    )(x2d, w1t, b1r, w2t, b2r, g_r, be_r)

    if M_pad != M:
        out2d = out2d[:M]
    return out2d.reshape(B, S, d_model)


def reference(x, w1, b1, w2, b2, gamma, beta, eps=1e-5):
    """Pure-JAX reference, PyTorch nn.Linear layout ([out, in]) weights."""
    h = jnp.maximum(jnp.einsum("bsd,fd->bsf", x, w1) + b1, 0.0)
    y = jnp.einsum("bsf,df->bsd", h, w2) + b2
    z = x + y
    mean = jnp.mean(z, axis=-1, keepdims=True)
    var = jnp.mean((z - mean) ** 2, axis=-1, keepdims=True)
    return (z - mean) / jnp.sqrt(var + eps) * gamma + beta


if __name__ == "__main__":
    B, S, d_model, d_ff = 2, 8, 32, 64

    key = jax.random.PRNGKey(0)
    kx, k1, k2, k3, k4 = jax.random.split(key, 5)

    x = jax.random.normal(kx, (B, S, d_model), dtype=jnp.float32)

    # Deterministic synthetic parameters (PyTorch nn.Linear layout: [out, in]).
    w1 = jax.random.normal(k1, (d_ff, d_model), dtype=jnp.float32) * 0.05
    b1 = jax.random.normal(k2, (d_ff,), dtype=jnp.float32) * 0.05
    w2 = jax.random.normal(k3, (d_model, d_ff), dtype=jnp.float32) * 0.05
    b2 = jax.random.normal(k4, (d_model,), dtype=jnp.float32) * 0.05
    gamma = jnp.ones((d_model,), dtype=jnp.float32)
    beta = jnp.zeros((d_model,), dtype=jnp.float32)

    # Weight transposes hoisted out of the forward call ("model load" time).
    w1t = jnp.asarray(w1.T)   # [d_model, d_ff]
    w2t = jnp.asarray(w2.T)   # [d_ff, d_model]

    out = position_wise_ffn_ln(x, w1t, b1, w2t, b2, gamma, beta)
    out = jax.block_until_ready(out)

    ref = reference(x, w1, b1, w2, b2, gamma, beta)
    assert out.shape == (B, S, d_model)
    assert jnp.allclose(out, ref, atol=1e-4, rtol=1e-4), "mismatch vs reference"

    print("KERNEL_OK")
</pallas_src>

<mosaic_0001>
module attributes {stable_mosaic.version = 11 : i64} {
  func.func @ffn_ln_kernel(%arg0: i32, %arg1: i32, %arg2: memref<8x32xf32, #tpu.memory_space<vmem>>, %arg3: memref<32x64xf32, #tpu.memory_space<vmem>>, %arg4: memref<1x64xf32, #tpu.memory_space<vmem>>, %arg5: memref<64x32xf32, #tpu.memory_space<vmem>>, %arg6: memref<1x32xf32, #tpu.memory_space<vmem>>, %arg7: memref<1x32xf32, #tpu.memory_space<vmem>>, %arg8: memref<1x32xf32, #tpu.memory_space<vmem>>, %arg9: memref<8x32xf32, #tpu.memory_space<vmem>>, %arg10: memref<8x32xf32, #tpu.memory_space<vmem>>) attributes {dimension_semantics = [#tpu.dimension_semantics<parallel>, #tpu.dimension_semantics<arbitrary>], iteration_bounds = array<i64: 2, 1>, scalar_prefetch = 0 : i64, scratch_operands = 1 : i64, tpu.core_type = #tpu.core_type<tc>, window_params = [{transform_indices = @transform_0, window_bounds = array<i64: 8, 32>}, {transform_indices = @transform_1, window_bounds = array<i64: 32, 64>}, {transform_indices = @transform_2, window_bounds = array<i64: 1, 64>}, {transform_indices = @transform_3, window_bounds = array<i64: 64, 32>}, {pipeline_mode = #tpu.pipeline_mode<synchronous>, transform_indices = @transform_4, window_bounds = array<i64: 1, 32>}, {pipeline_mode = #tpu.pipeline_mode<synchronous>, transform_indices = @transform_5, window_bounds = array<i64: 1, 32>}, {pipeline_mode = #tpu.pipeline_mode<synchronous>, transform_indices = @transform_6, window_bounds = array<i64: 1, 32>}, {transform_indices = @transform_7, window_bounds = array<i64: 8, 32>}]} {
    %c0_i32 = arith.constant 0 : i32
    %0 = arith.cmpi eq, %arg1, %c0_i32 : i32
    %1 = arith.extui %0 : i1 to i32
    %c0_i32_0 = arith.constant 0 : i32
    %2 = arith.cmpi ne, %1, %c0_i32_0 : i32
    scf.if %2 {
      %cst_16 = arith.constant 0.000000e+00 : f32
      %19 = vector.broadcast %cst_16 : f32 to vector<8x32xf32>
      %c0_17 = arith.constant 0 : index
      %c0_18 = arith.constant 0 : index
      %20 = vector.load %arg10[%c0_17, %c0_18] : memref<8x32xf32, #tpu.memory_space<vmem>>, vector<8x32xf32>
      tpu.vector_store %arg10[%c0_17, %c0_18], %19 {strides = array<i32>} : memref<8x32xf32, #tpu.memory_space<vmem>>, vector<8x32xf32>,
    } else {
    }
    %c0 = arith.constant 0 : index
    %c0_1 = arith.constant 0 : index
    %3 = vector.load %arg2[%c0, %c0_1] : memref<8x32xf32, #tpu.memory_space<vmem>>, vector<8x32xf32>
    %c0_2 = arith.constant 0 : index
    %c0_3 = arith.constant 0 : index
    %4 = vector.load %arg3[%c0_2, %c0_3] : memref<32x64xf32, #tpu.memory_space<vmem>>, vector<32x64xf32>
    %cst = arith.constant dense<0.000000e+00> : vector<8x64xf32>
    %5 = tpu.matmul %3, %4, %cst {dimension_numbers = #tpu.dot_dimension_numbers<[1], [0], [0], [1], [0, 0, 1, 1], [], []>} : vector<8x32xf32>, vector<32x64xf32>, vector<8x64xf32> -> vector<8x64xf32>
    %c0_4 = arith.constant 0 : index
    %c0_5 = arith.constant 0 : index
    %6 = vector.load %arg4[%c0_4, %c0_5] : memref<1x64xf32, #tpu.memory_space<vmem>>, vector<1x64xf32>
    %7 = vector.broadcast %6 : vector<1x64xf32> to vector<8x64xf32>
    %8 = arith.addf %5, %7 : vector<8x64xf32>
    %cst_6 = arith.constant 0.000000e+00 : f32
    %9 = vector.broadcast %cst_6 : f32 to vector<8x64xf32>
    %10 = arith.maximumf %8, %9 : vector<8x64xf32>
    %c0_7 = arith.constant 0 : index
    %c0_8 = arith.constant 0 : index
    %11 = vector.load %arg10[%c0_7, %c0_8] : memref<8x32xf32, #tpu.memory_space<vmem>>, vector<8x32xf32>
    %c0_9 = arith.constant 0 : index
    %c0_10 = arith.constant 0 : index
    %12 = vector.load %arg5[%c0_9, %c0_10] : memref<64x32xf32, #tpu.memory_space<vmem>>, vector<64x32xf32>
    %cst_11 = arith.constant dense<0.000000e+00> : vector<8x32xf32>
    %13 = tpu.matmul %10, %12, %cst_11 {dimension_numbers = #tpu.dot_dimension_numbers<[1], [0], [0], [1], [0, 0, 1, 1], [], []>} : vector<8x64xf32>, vector<64x32xf32>, vector<8x32xf32> -> vector<8x32xf32>
    %14 = arith.addf %11, %13 : vector<8x32xf32>
    %c0_12 = arith.constant 0 : index
    %c0_13 = arith.constant 0 : index
    %15 = vector.load %arg10[%c0_12, %c0_13] : memref<8x32xf32, #tpu.memory_space<vmem>>, vector<8x32xf32>
    tpu.vector_store %arg10[%c0_12, %c0_13], %14 {strides = array<i32>} : memref<8x32xf32, #tpu.memory_space<vmem>>, vector<8x32xf32>,
    %c0_i32_14 = arith.constant 0 : i32
    %16 = arith.cmpi eq, %arg1, %c0_i32_14 : i32
    %17 = arith.extui %16 : i1 to i32
    %c0_i32_15 = arith.constant 0 : i32
    %18 = arith.cmpi ne, %17, %c0_i32_15 : i32
    scf.if %18 {
      %c0_16 = arith.constant 0 : index
      %c0_17 = arith.constant 0 : index
      %19 = vector.load %arg10[%c0_16, %c0_17] : memref<8x32xf32, #tpu.memory_space<vmem>>, vector<8x32xf32>
      %20 = arith.addf %3, %19 : vector<8x32xf32>
      %c0_18 = arith.constant 0 : index
      %c0_19 = arith.constant 0 : index
      %21 = vector.load %arg6[%c0_18, %c0_19] : memref<1x32xf32, #tpu.memory_space<vmem>>, vector<1x32xf32>
      %22 = vector.broadcast %21 : vector<1x32xf32> to vector<8x32xf32>
      %23 = arith.addf %20, %22 : vector<8x32xf32>
      %cst_20 = arith.constant dense<0.000000e+00> : vector<8xf32>
      %24 = vector.multi_reduction <add>, %23, %cst_20 [1] : vector<8x32xf32> to vector<8xf32>
      %25 = vector.shape_cast %24 : vector<8xf32> to vector<8x1xf32>
      %cst_21 = arith.constant 3.200000e+01 : f32
      %26 = vector.broadcast %cst_21 : f32 to vector<8x1xf32>
      %27 = arith.divf %25, %26 : vector<8x1xf32>
      %28 = arith.mulf %23, %23 : vector<8x32xf32>
      %cst_22 = arith.constant dense<0.000000e+00> : vector<8xf32>
      %29 = vector.multi_reduction <add>, %28, %cst_22 [1] : vector<8x32xf32> to vector<8xf32>
      %30 = vector.shape_cast %29 : vector<8xf32> to vector<8x1xf32>
      %cst_23 = arith.constant 3.200000e+01 : f32
      %31 = vector.broadcast %cst_23 : f32 to vector<8x1xf32>
      %32 = arith.divf %30, %31 : vector<8x1xf32>
      %33 = arith.mulf %27, %27 : vector<8x1xf32>
      %34 = arith.subf %32, %33 : vector<8x1xf32>
      %cst_24 = arith.constant 0.000000e+00 : f32
      %35 = vector.broadcast %cst_24 : f32 to vector<8x1xf32>
      %36 = arith.maximumf %34, %35 : vector<8x1xf32>
      %37 = vector.broadcast %27 : vector<8x1xf32> to vector<8x32xf32>
      %38 = arith.subf %23, %37 : vector<8x32xf32>
      %cst_25 = arith.constant 9.99999974E-6 : f32
      %39 = vector.broadcast %cst_25 : f32 to vector<8x1xf32>
      %40 = arith.addf %36, %39 : vector<8x1xf32>
      %41 = math.rsqrt %40 : vector<8x1xf32>
      %42 = vector.broadcast %41 : vector<8x1xf32> to vector<8x32xf32>
      %43 = arith.mulf %38, %42 : vector<8x32xf32>
      %c0_26 = arith.constant 0 : index
      %c0_27 = arith.constant 0 : index
      %44 = vector.load %arg7[%c0_26, %c0_27] : memref<1x32xf32, #tpu.memory_space<vmem>>, vector<1x32xf32>
      %45 = vector.broadcast %44 : vector<1x32xf32> to vector<8x32xf32>
      %46 = arith.mulf %43, %45 : vector<8x32xf32>
      %c0_28 = arith.constant 0 : index
      %c0_29 = arith.constant 0 : index
      %47 = vector.load %arg8[%c0_28, %c0_29] : memref<1x32xf32, #tpu.memory_space<vmem>>, vector<1x32xf32>
      %48 = vector.broadcast %47 : vector<1x32xf32> to vector<8x32xf32>
      %49 = arith.addf %46, %48 : vector<8x32xf32>
      %c0_30 = arith.constant 0 : index
      %c0_31 = arith.constant 0 : index
      %50 = vector.load %arg9[%c0_30, %c0_31] : memref<8x32xf32, #tpu.memory_space<vmem>>, vector<8x32xf32>
      tpu.vector_store %arg9[%c0_30, %c0_31], %49 {strides = array<i32>} : memref<8x32xf32, #tpu.memory_space<vmem>>, vector<8x32xf32>,
    } else {
    }
    return
  }
  func.func @transform_0(%arg0: i32, %arg1: i32) -> (i32, i32) {
    %c0_i32 = arith.constant 0 : i32
    %c0_i32_0 = arith.constant 0 : i32
    return %arg0, %c0_i32 : i32, i32
  }
  func.func @transform_1(%arg0: i32, %arg1: i32) -> (i32, i32) {
    %c0_i32 = arith.constant 0 : i32
    %c0_i32_0 = arith.constant 0 : i32
    return %c0_i32, %arg1 : i32, i32
  }
  func.func @transform_2(%arg0: i32, %arg1: i32) -> (i32, i32) {
    %c0_i32 = arith.constant 0 : i32
    %c0_i32_0 = arith.constant 0 : i32
    return %c0_i32, %arg1 : i32, i32
  }
  func.func @transform_3(%arg0: i32, %arg1: i32) -> (i32, i32) {
    %c0_i32 = arith.constant 0 : i32
    %c0_i32_0 = arith.constant 0 : i32
    return %arg1, %c0_i32 : i32, i32
  }
  func.func @transform_4(%arg0: i32, %arg1: i32) -> (i32, i32) {
    %c0_i32 = arith.constant 0 : i32
    %c0_i32_0 = arith.constant 0 : i32
    %c0_i32_1 = arith.constant 0 : i32
    return %c0_i32, %c0_i32_0 : i32, i32
  }
  func.func @transform_5(%arg0: i32, %arg1: i32) -> (i32, i32) {
    %c0_i32 = arith.constant 0 : i32
    %c0_i32_0 = arith.constant 0 : i32
    %c0_i32_1 = arith.constant 0 : i32
    return %c0_i32, %c0_i32_0 : i32, i32
  }
  func.func @transform_6(%arg0: i32, %arg1: i32) -> (i32, i32) {
    %c0_i32 = arith.constant 0 : i32
    %c0_i32_0 = arith.constant 0 : i32
    %c0_i32_1 = arith.constant 0 : i32
    return %c0_i32, %c0_i32_0 : i32, i32
  }
  func.func @transform_7(%arg0: i32, %arg1: i32) -> (i32, i32) {
    %c0_i32 = arith.constant 0 : i32
    %c0_i32_0 = arith.constant 0 : i32
    return %arg0, %c0_i32 : i32, i32
  }
}

</mosaic_0001>

<bundles_post_ra>
// kernel: tpu_custom_call.1
= control target key start
LH: loop header
LB: loop body
LE: loop exit
PB: predicated region body
PF: predicated region fallthrough
CT: control target
= control target key end

     0   :  { %12 = vsyncpa [#allocation4], 0  ;;  %s1119_s0 = inlined_call_operand.vmem [shape: f32[16,32], index: 0, kind: input, shape index: {}]   ;;  %s1120_s1 = inlined_call_operand.vmem [shape: f32[32,64], index: 1, kind: input, shape index: {}]   ;;  %s1121_s2 = inlined_call_operand.vmem [shape: f32[1,64], index: 2, kind: input, shape index: {}]   ;;  %s1122_s3 = inlined_call_operand.vmem [shape: f32[64,32], index: 3, kind: input, shape index: {}]   ;;  %s1123_s4 = inlined_call_operand.vmem [shape: f32[1,32], index: 4, kind: input, shape index: {}]   ;;  %s1124_s5 = inlined_call_operand.vmem [shape: f32[1,32], index: 5, kind: input, shape index: {}]   ;;  %s1125_s6 = inlined_call_operand.vmem [shape: f32[1,32], index: 6, kind: input, shape index: {}]   ;;  %s1126_s7 = inlined_call_operand.hbm [shape: f32[16,32], index: 7, kind: output, shape index: {}]  }
   0x1   :  { %14 = vsyncpa [#allocation4 + $0x1], 0  ;;  %s953_s24 = smov 0   ;;  %s955_s25 = smov 0  }
   0x2   :  { %s957_s26 = smov 0   ;;  %s959_s27 = smov 0  }
   0x3   :  { %s961_s28 = smov 0   ;;  %s963_s29 = smov 0  }
   0x4 LB: > { %s687_s30 = sadd.s32 4294967295, %s907_s29   ;;  %s688_s8 = sadd.s32 4294967294, %s907_s29   ;;  %s907_s29 = sphi %s963_s29, %s20_s29   ;;  %s903_s28 = sphi %s961_s28, %s1133_s28   ;;  %s899_s27 = sphi %s959_s27, %s1132_s27   ;;  %s895_s26 = sphi %s957_s26, %s1131_s26   ;;  %s891_s25 = sphi %s955_s25, %s1130_s25   ;;  %s887_s24 = sphi %s953_s24, %s1129_s24  }
   0x5   : > { %s32_s9 = sadd.s32 1, %s903_s28  ;;  %s206_s10 = sadd.s32 1, %s895_s26 }
   0x6   : > { %p34_p0 = scmp.ge.s32.totalorder %s32_s9, 2  ;;  %p216_p1 = scmp.ne.s32.totalorder %s895_s26, %s891_s25 }
   0x7   : > { %p217_p2 = scmp.eq.s32.totalorder %s687_s30, 1  ;;  %p222_p3 = scmp.ne.s32.totalorder %s891_s25, %s887_s24 }
   0x8   : > { %s1135_s9 = smov (%p34_p0, %s32_s9), 0  ;;  %p223_p5 = scmp.eq.s32.totalorder %s688_s8, 1 }
   0x9   : > { %p993_p4 = por %p217_p2, %p216_p1  ;;  %s203_s12 = ssub.s32 %s903_s28, %s1135_s9 }
   0xa   : > { %p694_p6 = scmp.ge.s32.totalorder %s907_s29, 1  ;;  %p204_p7 = scmp.eq.s32.totalorder %s203_s12, 0 }
   0xb   : > { %p1000_p8 = por %p223_p5, %p222_p3  ;;  %p279_p9 = scmp.lt.s32.totalorder %s907_s29, 3 }
   0xc   : > { %s1006_s14 = scalar_select %p204_p7, %s895_s26, %s206_s10  }
   0xd   : > { %p280_p10 = pnand %p694_p6, %p279_p9 }
   0xe   : > { %v346_v0 = vld [vmem:[%s1120_s1] sm:$0xff] (!%p280_p10)  ;;  %v347_v1 = vld [vmem:[%s1120_s1 + $0x8] sm:$0xff] (!%p280_p10)  ;;  %v348_v2 = vld [vmem:[%s1120_s1 + $0x10] sm:$0xff] (!%p280_p10)  ;;  %vm343_vm0 = vcmask (!%p280_p10), 261120   ;;  %v909_v3 = vmov (!%p280_p10), 0.0|0.0   ;;  %v910_v6 = vmov (!%p280_p10), 0.0  }
   0xf   : > { %283 = sbr.rel (%p280_p10) target bundleno = 655 (0x28f), region = 48  ;;  %751 = vmatprep.subr.bf16.mxu0 (!%p280_p10), %v909_v3  ;;  %v752_v4 = vpack.c.bf16 (!%p280_p10), %v347_v1, %v346_v0  ;;  %v349_v5 = vld [vmem:[%s1120_s1 + $0x18] sm:$0xff] (!%p280_p10)  ;;  %344 = vst.msk [vmem:[#allocation2] sm:$0xff] (!%p280_p10), %vm343_vm0, %v910_v6  ;;  %p322_p11 = scmp.lt.s32.totalorder (!%p280_p10), %s899_s27, 1  ;;  %757 = vmatprep.subr.bf16.mxu1 (!%p280_p10), %v909_v3  ;;  %v433_v7 = vld [vmem:[%s1122_s3] sm:$0xff] (!%p280_p10)  ;;  %v434_v8 = vld [vmem:[%s1122_s3 + $0x8] sm:$0xff] (!%p280_p10) }
  0x10   : > { %vm911_vm1 = vmmov (!%p280_p10), 0   ;;  %v758_v9 = vpack.c.bf16 (!%p280_p10), %v434_v8, %v433_v7  ;;  %v435_v10 = vld [vmem:[%s1122_s3 + $0x10] sm:$0xff] (!%p280_p10)  ;;  %v436_v11 = vld [vmem:[%s1122_s3 + $0x18] sm:$0xff] (!%p280_p10)  ;;  %v755_v12 = vpack.c.bf16 (!%p280_p10), %v349_v5, %v348_v2  ;;  %v437_v14 = vld [vmem:[%s1122_s3 + $0x20] sm:$0xff] (!%p280_p10)  ;;  %vm441_vm2 = vcmask (!%p280_p10), 523264   ;;  %s319_s22 = sand.u32 (!%p280_p10), 1, %s891_s25  }
  0x11   : > { %729 = vmatprep.mubr.msk.f32.mxu0 (!%p280_p10), %vm911_vm1, %v910_v6  ;;  %748 = vmatprep.mubr.msk.f32.mxu1 (!%p280_p10), %vm911_vm1, %v910_v6  ;;  %v761_v13 = vpack.c.bf16 (!%p280_p10), %v436_v11, %v435_v10  ;;  %v438_v15 = vld [vmem:[%s1122_s3 + $0x28] sm:$0xff] (!%p280_p10)  ;;  %v439_v18 = vld [vmem:[%s1122_s3 + $0x30] sm:$0xff] (!%p280_p10)  ;;  %v440_v19 = vld [vmem:[%s1122_s3 + $0x38] sm:$0xff] (!%p280_p10)  ;;  %s695_s23 = sshll.u32 (!%p280_p10), %s319_s22, 3  ;;  %s704_s15 = sshll.u32 (!%p280_p10), %s899_s27, 7 }
  0x12   : > { %753 = vmatpush3.bf16.msra.mxu0 (!%p280_p10), %v752_v4  ;;  %759 = vmatpush3.bf16.msra.mxu1 (!%p280_p10), %v758_v9  ;;  %v764_v17 = vpack.c.bf16 (!%p280_p10), %v438_v15, %v437_v14  ;;  %v767_v20 = vpack.c.bf16 (!%p280_p10), %v440_v19, %v439_v18  ;;  %v697_v21 = vld [vmem:[%s1121_s2] ss:$0 sm:$0xff] (!%p280_p10)  ;;  %s321_s16 = scalar_lea.vmem (!%p280_p10), [#allocation3], %s695_s23  ;;  %s1071_s20 = scalar_lea.hbm (!%p280_p10), %s1126_s7, %s704_s15 }
  0x13   : > { %754 = vmatprep.subr.bf16.mxu0 (!%p280_p10), %v909_v3  ;;  %760 = vmatprep.subr.bf16.mxu1 (!%p280_p10), %v909_v3  ;;  %v700_v31 = vld [vmem:[%s1123_s4] ss:$0 sm:$0xff] (!%p280_p10)  ;;  %s578_s17 = sshll.u32 (!%p280_p10), %s321_s16, 4  ;;  %s565_s21 = scalar_lea.sflag (!%p280_p10), [#allocation4], %s319_s22  ;;  %s1073_s17 = int_to_ptr.vmem [resolvable:$true] %s578_s17 }
  0x14   : > { %v701_v47 = vld [vmem:[%s1124_s5] ss:$0 sm:$0xff] (!%p280_p10)  ;;  %s829_s30 = scalar_lea.vmem (!%p280_p10), %s1073_s17, 128 }
  0x15   : > { %v702_v49 = vld [vmem:[%s1125_s6] ss:$0 sm:$0xff] (!%p280_p10)  ;;  %p830_p12 = scmp.ne.s32.totalorder (!%p280_p10), %s1073_s17, %s829_s30 }
  0x16   : > { %s323_s18 = scalar_select %p322_p11, %s899_s27, 1  ;;  %756 = vmatpush3.bf16.msra.mxu0 %v755_v12  ;;  %762 = vmatpush3.bf16.msra.mxu1 %v761_v13  ;;  %v432_v26 = vld [vmem:[#allocation2] sm:$0xff] }
  0x17   : > { %763 = vmatprep.subr.bf16.mxu1 %v909_v3  ;;  %p831_p13 = pnand %p830_p12, %p993_p4  ;;  %s912_s27 = smov [#allocation3]  }
  0x18   : > { %s696_s19 = sshll.u32 %s323_s18, 3  ;;  %s833_s23 = sshll.u32 %s912_s27, 4  ;;  %s834_s23 = int_to_ptr.vmem [resolvable:$false] %s833_s23 }
  0x19   : > { %s325_s10 = scalar_lea.vmem %s1119_s0, %s696_s19  ;;  %p832_p0 = pneg %p831_p13 }
  0x1a   : > { %v345_v16 = vld [vmem:[%s325_s10] sm:$0xff]  ;;  %765 = vmatpush3.bf16.msra.mxu1 %v764_v17  ;;  %s835_s8 = scalar_lea.vmem %s834_s23, 256  ;;  %p836_p1 = scmp.lt.s32.totalorder %s1073_s17, %s834_s23 }
  0x1b   : > { %730 = vmatmul.mubr.msk.f32.vlgmr.msra.gmra.mrb[0].mxu0 %vm343_vm0, %v345_v16  ;;  %766 = vmatprep.subr.bf16.mxu1 %v909_v3  ;;  %p837_p2 = scmp.lt.s32.totalorder %s835_s8, %s829_s30 }
  0x1d   : > { %p838_p3 = por %p837_p2, %p836_p1 }
  0x1e   : > { %768 = vmatpush3.bf16.msra.mxu1 %v767_v20 }
  0x1f   : > { %p839_p5 = pnand %p838_p3, %p832_p0 }
  0xee   : > { %v427_v22 = vpop.f32.mrb[0].mxu0 }
  0xef   : > { %v428_v23 = vadd.f32 %v697_v21, %v427_v22  ;;  %v731_v24 = vpop.f32.mrb[1].mxu0 }
  0xf1   : > { %v431_v25 = vmax.f32 %v428_v23, 0.0 }
  0xf3   : > { %749 = vmatmul.mubr.msk.f32.vlgmr.msra.gmra.mrb[0].mxu1 %vm441_vm2, %v431_v25 }
 0x1c6   : > { %v511_v27 = vpop.f32.mrb[0].mxu1 }
 0x1c7   : > { %v515_v28 = vadd.f32 %v511_v27, %v432_v26  ;;  %v750_v29 = vpop.f32.mrb[1].mxu1 }
 0x1c9   : > { %516 = vst.msk [vmem:[#allocation2] sm:$0xff] %vm343_vm0, %v515_v28 }
 0x1d0   : > { %v520_v30 = vld [vmem:[#allocation2] sm:$0xff] }
 0x1d1   : > { %v521_v32 = vadd.f32 %v520_v30, %v345_v16 }
 0x1d3   : > { %v529_v33 = vadd.f32 %v700_v31, %v521_v32 }
 0x1d5   : > { %v530_v34 = vsel %vm343_vm0, %v529_v33, 0.0  ;;  %v535_v35 = vmul.f32 %v529_v33, %v529_v33 }
 0x1d6   : > { %531 = vadd.xlane.f32.xlu0 %v530_v34 }
 0x1d7   : > { %v536_v36 = vsel %vm343_vm0, %v535_v35, 0.0 }
 0x1da   : > { %537 = vadd.xlane.f32.xlu0 %v536_v36 }
 0x263   : > { %v532_v37 = vpop.xlane.xlu0 %531 }
 0x264   : > { %v534_v38 = vmul.f32 0.03125, %v532_v37 }
 0x266   : > { %v540_v40 = vmul.f32 %v534_v38, %v534_v38  ;;  %v543_v45 = vsub.f32 %v529_v33, %v534_v38 }
 0x267   : > { %v538_v39 = vpop.xlane.xlu0 %537 }
 0x268   : > { %v539_v41 = vmul.f32 0.03125, %v538_v39 }
 0x26a   : > { %v541_v42 = vsub.f32 %v539_v41, %v540_v40 }
 0x26c   : > { %v542_v43 = vmax.f32 %v541_v42, 0.0 }
 0x26e   : > { %v544_v44 = vadd.f32 1e-05, %v542_v43 }
 0x270   : > { %827 = vrsqrt.f32 %v544_v44 }
 0x27a   : > { %v828_v46 = vpop.eup %827 }
 0x27b   : > { %v546_v48 = vmul.f32 %v828_v46, %v543_v45 }
 0x27d   : > { %v554_v50 = vmul.f32 %v701_v47, %v546_v48 }
 0x27f   : > { %v562_v51 = vadd.f32 %v702_v49, %v554_v50 }
 0x281   : > { %563 = vst.msk [vmem:[%s321_s16] sm:$0xff] %vm343_vm0, %v562_v51 }
 0x282   : > { %842 = shalt.err (!%p839_p5)
}
 0x283   : > { %s843_s22 = scalar_lea.hbm %s1071_s20, 128  ;;  %s847_s15 = scalar_lea.hbm %s1126_s7, 256 }
 0x284   : > { %p844_p6 = scmp.ne.s32.totalorder %s1071_s20, %s843_s22  ;;  %p848_p10 = scmp.lt.u32.totalorder %s1071_s20, %s1126_s7 }
 0x285   : > { %p849_p11 = scmp.lt.u32.totalorder %s847_s15, %s843_s22  ;;  %p851_p13 = scmp.lt.u32.totalorder %s843_s22, %s1071_s20 }
 0x286   : > { %p845_p7 = pnand %p844_p6, %p993_p4 }
 0x287   : > { %p850_p12 = por %p849_p11, %p848_p10 }
 0x288   : > { %p846_p9 = pneg %p845_p7 }
 0x289   : > { %p852_p0 = por %p851_p13, %p850_p12 }
 0x28b   : > { %p853_p1 = pnand %p852_p0, %p846_p9 }
 0x28d   : > { %856 = shalt.err (!%p853_p1)
}
 0x28e   : > { %769 = dma.vmem_to_hbm [thread:$0]  (%p993_p4), %s1073_s17, 128, %s1071_s20, %s565_s21  }
 0x28f PF: > { %p775_p2 = scmp.ge.s32.totalorder %s907_s29, 2  ;;  %s590_s19 = sand.u32 1, %s887_s24  }
 0x290   : > { %s591_s30 = scalar_lea.sflag [#allocation4], %s590_s19 }
 0x291   : > { %p772_p3 = pnand %p775_p2, %p1000_p8 }
 0x293   : > { %882 = dma.done.wait (!%p772_p3), %s591_s30, 128  }
 0x294   : > { %884 = vsyncadd (!%p772_p3), %s591_s30, 4294967168  ;;  %s20_s29 = sadd.s32 1, %s907_s29   ;;  %s1129_s24 = smov %s891_s25 }
 0x295   : > { %p17_p5 = scmp.ge.s32.totalorder %s20_s29, 4   ;;  %s1130_s25 = smov %s895_s26 }
 0x296   : > { %s1131_s26 = smov %s1006_s14  ;;  %s1132_s27 = smov %s903_s28 }
 0x297   : > { %s1133_s28 = smov %s1135_s9  ;;  %19 = sbr.rel (!%p17_p5) target bundleno = 4 (0x4), region = 100 }
 0x29e   :  { %596 = vsyncpa [#allocation4], 1 }
 0x29f   :  { %598 = vsyncpa [#allocation4 + $0x1], 1 }

</bundles_post_ra>
